<compile_context>
chip_gen: v7x
topology: tpu7x:2x2x1
jax: 0.10.0
libtpu: 0.0.40
codegen_flags: <defaults>
</compile_context>

<pallas_src>
import jax
import jax.numpy as jnp
import numpy as np
from jax import lax
from jax.experimental import pallas as pl
from jax.experimental.pallas import tpu as pltpu


def _tcn_stack_kernel(cfgs, k, W):
    """Kernel factory. `cfgs` is a list of per-layer static configs."""

    def rshift(a, s):
        # Shift right by `s` lanes, shifting in zeros (explicit, so the conv
        # zero-padding is correct by construction). s is a static Python int.
        if s == 0:
            return a
        z = jnp.zeros((a.shape[0], s), a.dtype)
        return jnp.concatenate([z, a[:, :W - s]], axis=-1)

    def kernel(x_ref, *refs):
        o_ref = refs[-1]
        wrefs = refs[:-1]
        col = lax.broadcasted_iota(jnp.int32, (1, W), 1)  # hoisted, reused

        a_lo = x_ref[0]                              # (Cin0, W) compute dtype
        a_f32 = a_lo.astype(jnp.float32)
        idx = 0
        for cfg in cfgs:
            d, p, l_in = cfg["dilation"], cfg["pad"], cfg["l_in"]
            l1 = l_in + p                            # conv1 output length
            l2 = l_in + 2 * p                        # conv2 output length
            w1s = wrefs[idx][...]                    # (Cout, k*Cin)   bf16
            b1 = wrefs[idx + 1][...]                 # (Cout, 1)       f32
            w2s = wrefs[idx + 2][...]                # (Cout, k*Cout)  bf16
            b2 = wrefs[idx + 3][...]                 # (Cout, 1)       f32
            idx += 4
            if cfg["has_ds"]:
                wd = wrefs[idx][...]                 # (Cout, Cin)     bf16
                bd = wrefs[idx + 1][...]             # (Cout, 1)       f32
                idx += 2

            # ---- conv1: k taps stacked into one MXU matmul, f32 acc ----
            x1 = jnp.concatenate(
                [rshift(a_lo, (k - 1 - j) * d) for j in range(k)], axis=0)
            y1 = jnp.dot(w1s, x1, preferred_element_type=jnp.float32) + b1
            y1 = jnp.maximum(y1, 0.0)                # ReLU (dropout = identity)
            y1 = jnp.where(col < l1, y1, 0.0)        # zero pad region for conv2

            # ---- conv2 ----
            y1_lo = y1.astype(a_lo.dtype)
            x2 = jnp.concatenate(
                [rshift(y1_lo, (k - 1 - j) * d) for j in range(k)], axis=0)
            y2 = jnp.dot(w2s, x2, preferred_element_type=jnp.float32) + b2

            # ---- residual (right-zero-padded to length l2, as in F.pad) ----
            if cfg["has_ds"]:
                res = jnp.dot(wd, a_lo, preferred_element_type=jnp.float32)
                res = res + jnp.where(col < l_in, bd, 0.0)
            else:
                res = a_f32                          # Cin == Cout

            out = jnp.maximum(y2 + res, 0.0)         # final ReLU
            out = jnp.where(col < l2, out, 0.0)      # keep zeros beyond l2

            a_f32 = out
            a_lo = out.astype(a_lo.dtype)

        o_ref[0] = a_f32.astype(o_ref.dtype)         # single lane-dense store

    return kernel


def tcn_forward(x, params, kernel_size=2, compute_dtype=jnp.bfloat16):
    """Fused TCN forward. x:(B,Cin,L) -> (B,Cout_last,L_final)."""
    B, c_in0, l0 = x.shape
    k = kernel_size

    # Static per-layer configuration.
    cfgs = []
    c_in, l_cur = c_in0, l0
    for i, p in enumerate(params):
        d = 2 ** i
        pad = (k - 1) * d
        c_out = p["w1"].shape[0]
        has_ds = ("wd" in p) and (p["wd"] is not None)
        cfgs.append(dict(dilation=d, pad=pad, l_in=l_cur,
                         c_in=c_in, c_out=c_out, has_ds=has_ds))
        l_cur = l_cur + 2 * pad
        c_in = c_out
    l_final = l_cur
    c_out_last = cfgs[-1]["c_out"]

    # Lane-dense working width (multiple of 128).
    W = ((l_final + 127) // 128) * 128

    # Pad input once to the working width; cast MXU operands to bf16.
    xp = jnp.pad(x, ((0, 0), (0, 0), (0, W - l0))).astype(compute_dtype)

    args = [xp]
    in_specs = [pl.BlockSpec((1, c_in0, W), lambda b: (b, 0, 0))]
    for p, cfg in zip(params, cfgs):
        ci, co = cfg["c_in"], cfg["c_out"]
        # (Cout, Cin, k) -> (Cout, k*Cin): column block j holds tap j's weights.
        w1s = jnp.transpose(p["w1"], (0, 2, 1)).reshape(co, k * ci)
        w2s = jnp.transpose(p["w2"], (0, 2, 1)).reshape(co, k * co)
        args += [w1s.astype(compute_dtype),
                 p["b1"].reshape(co, 1).astype(jnp.float32),
                 w2s.astype(compute_dtype),
                 p["b2"].reshape(co, 1).astype(jnp.float32)]
        in_specs += [pl.BlockSpec((co, k * ci), lambda b: (0, 0)),
                     pl.BlockSpec((co, 1), lambda b: (0, 0)),
                     pl.BlockSpec((co, k * co), lambda b: (0, 0)),
                     pl.BlockSpec((co, 1), lambda b: (0, 0))]
        if cfg["has_ds"]:
            args += [p["wd"].astype(compute_dtype),
                     p["bd"].reshape(co, 1).astype(jnp.float32)]
            in_specs += [pl.BlockSpec((co, ci), lambda b: (0, 0)),
                         pl.BlockSpec((co, 1), lambda b: (0, 0))]

    kernel = _tcn_stack_kernel(cfgs, k, W)

    out = pl.pallas_call(
        kernel,
        out_shape=jax.ShapeDtypeStruct((B, c_out_last, W), x.dtype),
        grid_spec=pltpu.PrefetchScalarGridSpec(
            num_scalar_prefetch=0,
            grid=(B,),                               # 2 steps -> both v7x TCs
            in_specs=in_specs,
            out_specs=pl.BlockSpec((1, c_out_last, W), lambda b: (b, 0, 0)),
        ),
        compiler_params=pltpu.CompilerParams(
            dimension_semantics=("parallel",),
        ),
    )(*args)
    return out[:, :, :l_final]


def init_tcn_params(key, input_size, num_channels, kernel_size=2):
    """PyTorch-Conv1d-style uniform init (exact distribution is irrelevant here)."""
    params = []
    c_in = input_size
    for c_out in num_channels:
        key, k1, k2, k3, k4, k5, k6 = jax.random.split(key, 7)
        s1 = 1.0 / np.sqrt(c_in * kernel_size)
        s2 = 1.0 / np.sqrt(c_out * kernel_size)
        p = {
            "w1": jax.random.uniform(k1, (c_out, c_in, kernel_size), jnp.float32, -s1, s1),
            "b1": jax.random.uniform(k2, (c_out,), jnp.float32, -s1, s1),
            "w2": jax.random.uniform(k3, (c_out, c_out, kernel_size), jnp.float32, -s2, s2),
            "b2": jax.random.uniform(k4, (c_out,), jnp.float32, -s2, s2),
        }
        if c_in != c_out:
            sd = 1.0 / np.sqrt(c_in)
            p["wd"] = jax.random.uniform(k5, (c_out, c_in), jnp.float32, -sd, sd)
            p["bd"] = jax.random.uniform(k6, (c_out,), jnp.float32, -sd, sd)
        params.append(p)
        c_in = c_out
    return params


# ------------------------- pure-JAX reference -------------------------

def _conv1d_ref(x, w, b, dilation, pad):
    out = lax.conv_general_dilated(
        x, w, window_strides=(1,), padding=[(pad, pad)],
        rhs_dilation=(dilation,),
        dimension_numbers=("NCH", "OIH", "NCH"),
        precision=lax.Precision.HIGHEST)
    return out + b[None, :, None]


def _reference(x, params, kernel_size=2):
    out = x
    for i, p in enumerate(params):
        d = 2 ** i
        pad = (kernel_size - 1) * d
        y = _conv1d_ref(out, p["w1"], p["b1"], d, pad)
        y = jnp.maximum(y, 0.0)
        y = _conv1d_ref(y, p["w2"], p["b2"], d, pad)
        if "wd" in p:
            res = jnp.einsum("oc,bcl->bol", p["wd"], out,
                             precision=lax.Precision.HIGHEST)
            res = res + p["bd"][None, :, None]
        else:
            res = out
        res = jnp.pad(res, ((0, 0), (0, 0), (0, y.shape[2] - res.shape[2])))
        out = jnp.maximum(y + res, 0.0)
    return out


if __name__ == "__main__":
    key = jax.random.PRNGKey(0)
    B, input_size, L = 2, 4, 16
    num_channels = [32, 32]
    kernel_size = 2

    key, kx, kp = jax.random.split(key, 3)
    x = jax.random.normal(kx, (B, input_size, L), jnp.float32)
    params = init_tcn_params(kp, input_size, num_channels, kernel_size)

    fwd = jax.jit(tcn_forward, static_argnames=("kernel_size", "compute_dtype"))

    ref = _reference(x, params, kernel_size=kernel_size)

    # Default (performance) path: bf16 MXU inputs, f32 accumulation / elementwise.
    out_bf16 = jax.block_until_ready(
        fwd(x, params, kernel_size=kernel_size, compute_dtype=jnp.bfloat16))
    np.testing.assert_allclose(np.asarray(out_bf16), np.asarray(ref),
                               rtol=5e-2, atol=5e-2)

    # Full-precision path: tight check of the kernel structure.
    out_f32 = jax.block_until_ready(
        fwd(x, params, kernel_size=kernel_size, compute_dtype=jnp.float32))
    np.testing.assert_allclose(np.asarray(out_f32), np.asarray(ref),
                               rtol=1e-3, atol=1e-3)

    print("KERNEL_OK")
</pallas_src>

<mosaic_0001>
module attributes {stable_mosaic.version = 11 : i64} {
  func.func @kernel(%arg0: i32, %arg1: memref<1x4x128xbf16, #tpu.memory_space<vmem>>, %arg2: memref<32x8xbf16, #tpu.memory_space<vmem>>, %arg3: memref<32x1xf32, #tpu.memory_space<vmem>>, %arg4: memref<32x64xbf16, #tpu.memory_space<vmem>>, %arg5: memref<32x1xf32, #tpu.memory_space<vmem>>, %arg6: memref<32x4xbf16, #tpu.memory_space<vmem>>, %arg7: memref<32x1xf32, #tpu.memory_space<vmem>>, %arg8: memref<32x64xbf16, #tpu.memory_space<vmem>>, %arg9: memref<32x1xf32, #tpu.memory_space<vmem>>, %arg10: memref<32x64xbf16, #tpu.memory_space<vmem>>, %arg11: memref<32x1xf32, #tpu.memory_space<vmem>>, %arg12: memref<1x32x128xf32, #tpu.memory_space<vmem>>) attributes {dimension_semantics = [#tpu.dimension_semantics<parallel>], iteration_bounds = array<i64: 2>, scalar_prefetch = 0 : i64, scratch_operands = 0 : i64, tpu.core_type = #tpu.core_type<tc>, window_params = [{transform_indices = @transform_0, window_bounds = array<i64: 1, 4, 128>}, {pipeline_mode = #tpu.pipeline_mode<synchronous>, transform_indices = @transform_1, window_bounds = array<i64: 32, 8>}, {pipeline_mode = #tpu.pipeline_mode<synchronous>, transform_indices = @transform_2, window_bounds = array<i64: 32, 1>}, {pipeline_mode = #tpu.pipeline_mode<synchronous>, transform_indices = @transform_3, window_bounds = array<i64: 32, 64>}, {pipeline_mode = #tpu.pipeline_mode<synchronous>, transform_indices = @transform_4, window_bounds = array<i64: 32, 1>}, {pipeline_mode = #tpu.pipeline_mode<synchronous>, transform_indices = @transform_5, window_bounds = array<i64: 32, 4>}, {pipeline_mode = #tpu.pipeline_mode<synchronous>, transform_indices = @transform_6, window_bounds = array<i64: 32, 1>}, {pipeline_mode = #tpu.pipeline_mode<synchronous>, transform_indices = @transform_7, window_bounds = array<i64: 32, 64>}, {pipeline_mode = #tpu.pipeline_mode<synchronous>, transform_indices = @transform_8, window_bounds = array<i64: 32, 1>}, {pipeline_mode = #tpu.pipeline_mode<synchronous>, transform_indices = @transform_9, window_bounds = array<i64: 32, 64>}, {pipeline_mode = #tpu.pipeline_mode<synchronous>, transform_indices = @transform_10, window_bounds = array<i64: 32, 1>}, {transform_indices = @transform_11, window_bounds = array<i64: 1, 32, 128>}]} {
    %0 = tpu.iota {dimensions = array<i32: 1>} : vector<1x128xi32>
    %c0 = arith.constant 0 : index
    %c0_0 = arith.constant 0 : index
    %c0_1 = arith.constant 0 : index
    %1 = vector.load %arg1[%c0, %c0_0, %c0_1] : memref<1x4x128xbf16, #tpu.memory_space<vmem>>, vector<1x4x128xbf16>
    %2 = vector.shape_cast %1 : vector<1x4x128xbf16> to vector<4x128xbf16>
    %c0_2 = arith.constant 0 : index
    %c0_3 = arith.constant 0 : index
    %3 = vector.load %arg2[%c0_2, %c0_3] : memref<32x8xbf16, #tpu.memory_space<vmem>>, vector<32x8xbf16>
    %c0_4 = arith.constant 0 : index
    %c0_5 = arith.constant 0 : index
    %4 = vector.load %arg3[%c0_4, %c0_5] : memref<32x1xf32, #tpu.memory_space<vmem>>, vector<32x1xf32>
    %c0_6 = arith.constant 0 : index
    %c0_7 = arith.constant 0 : index
    %5 = vector.load %arg4[%c0_6, %c0_7] : memref<32x64xbf16, #tpu.memory_space<vmem>>, vector<32x64xbf16>
    %c0_8 = arith.constant 0 : index
    %c0_9 = arith.constant 0 : index
    %6 = vector.load %arg5[%c0_8, %c0_9] : memref<32x1xf32, #tpu.memory_space<vmem>>, vector<32x1xf32>
    %c0_10 = arith.constant 0 : index
    %c0_11 = arith.constant 0 : index
    %7 = vector.load %arg6[%c0_10, %c0_11] : memref<32x4xbf16, #tpu.memory_space<vmem>>, vector<32x4xbf16>
    %c0_12 = arith.constant 0 : index
    %c0_13 = arith.constant 0 : index
    %8 = vector.load %arg7[%c0_12, %c0_13] : memref<32x1xf32, #tpu.memory_space<vmem>>, vector<32x1xf32>
    %cst = arith.constant 0.000000e+00 : bf16
    %9 = vector.broadcast %cst : bf16 to vector<4x1xbf16>
    %10 = vector.extract_strided_slice %2 {offsets = [0, 0], sizes = [4, 127], strides = [1, 1]} : vector<4x128xbf16> to vector<4x127xbf16>
    %11 = tpu.concatenate %9, %10 in 1 : vector<4x1xbf16>, vector<4x127xbf16> -> vector<4x128xbf16>
    %12 = tpu.concatenate %11, %2 in 0 : vector<4x128xbf16>, vector<4x128xbf16> -> vector<8x128xbf16>
    %cst_14 = arith.constant dense<0.000000e+00> : vector<32x128xf32>
    %13 = tpu.matmul %3, %12, %cst_14 {dimension_numbers = #tpu.dot_dimension_numbers<[1], [0], [0], [1], [0, 0, 1, 1], [], []>} : vector<32x8xbf16>, vector<8x128xbf16>, vector<32x128xf32> -> vector<32x128xf32>
    %14 = vector.broadcast %4 : vector<32x1xf32> to vector<32x128xf32>
    %15 = arith.addf %13, %14 : vector<32x128xf32>
    %cst_15 = arith.constant 0.000000e+00 : f32
    %16 = vector.broadcast %cst_15 : f32 to vector<32x128xf32>
    %17 = arith.maximumf %15, %16 : vector<32x128xf32>
    %c17_i32 = arith.constant 17 : i32
    %18 = vector.broadcast %c17_i32 : i32 to vector<1x128xi32>
    %19 = arith.cmpi slt, %0, %18 : vector<1x128xi32>
    %cst_16 = arith.constant 0.000000e+00 : f32
    %20 = vector.shape_cast %19 : vector<1x128xi1> to vector<1x128xi1>
    %21 = vector.broadcast %20 : vector<1x128xi1> to vector<32x128xi1>
    %22 = vector.broadcast %cst_16 : f32 to vector<32x128xf32>
    %23 = arith.select %21, %17, %22 : vector<32x128xi1>, vector<32x128xf32>
    %24 = arith.truncf %23 : vector<32x128xf32> to vector<32x128xbf16>
    %cst_17 = arith.constant 0.000000e+00 : bf16
    %25 = vector.broadcast %cst_17 : bf16 to vector<32x1xbf16>
    %26 = vector.extract_strided_slice %24 {offsets = [0, 0], sizes = [32, 127], strides = [1, 1]} : vector<32x128xbf16> to vector<32x127xbf16>
    %27 = tpu.concatenate %25, %26 in 1 : vector<32x1xbf16>, vector<32x127xbf16> -> vector<32x128xbf16>
    %28 = tpu.concatenate %27, %24 in 0 : vector<32x128xbf16>, vector<32x128xbf16> -> vector<64x128xbf16>
    %cst_18 = arith.constant dense<0.000000e+00> : vector<32x128xf32>
    %29 = tpu.matmul %5, %28, %cst_18 {dimension_numbers = #tpu.dot_dimension_numbers<[1], [0], [0], [1], [0, 0, 1, 1], [], []>} : vector<32x64xbf16>, vector<64x128xbf16>, vector<32x128xf32> -> vector<32x128xf32>
    %30 = vector.broadcast %6 : vector<32x1xf32> to vector<32x128xf32>
    %31 = arith.addf %29, %30 : vector<32x128xf32>
    %cst_19 = arith.constant dense<0.000000e+00> : vector<32x128xf32>
    %32 = tpu.matmul %7, %2, %cst_19 {dimension_numbers = #tpu.dot_dimension_numbers<[1], [0], [0], [1], [0, 0, 1, 1], [], []>} : vector<32x4xbf16>, vector<4x128xbf16>, vector<32x128xf32> -> vector<32x128xf32>
    %c16_i32 = arith.constant 16 : i32
    %33 = vector.broadcast %c16_i32 : i32 to vector<1x128xi32>
    %34 = arith.cmpi slt, %0, %33 : vector<1x128xi32>
    %cst_20 = arith.constant 0.000000e+00 : f32
    %35 = vector.shape_cast %34 : vector<1x128xi1> to vector<1x128xi1>
    %36 = vector.broadcast %35 : vector<1x128xi1> to vector<32x128xi1>
    %37 = vector.shape_cast %8 : vector<32x1xf32> to vector<32x1xf32>
    %38 = vector.broadcast %37 : vector<32x1xf32> to vector<32x128xf32>
    %39 = vector.broadcast %cst_20 : f32 to vector<32x128xf32>
    %40 = arith.select %36, %38, %39 : vector<32x128xi1>, vector<32x128xf32>
    %41 = arith.addf %32, %40 : vector<32x128xf32>
    %42 = arith.addf %31, %41 : vector<32x128xf32>
    %cst_21 = arith.constant 0.000000e+00 : f32
    %43 = vector.broadcast %cst_21 : f32 to vector<32x128xf32>
    %44 = arith.maximumf %42, %43 : vector<32x128xf32>
    %c18_i32 = arith.constant 18 : i32
    %45 = vector.broadcast %c18_i32 : i32 to vector<1x128xi32>
    %46 = arith.cmpi slt, %0, %45 : vector<1x128xi32>
    %cst_22 = arith.constant 0.000000e+00 : f32
    %47 = vector.shape_cast %46 : vector<1x128xi1> to vector<1x128xi1>
    %48 = vector.broadcast %47 : vector<1x128xi1> to vector<32x128xi1>
    %49 = vector.broadcast %cst_22 : f32 to vector<32x128xf32>
    %50 = arith.select %48, %44, %49 : vector<32x128xi1>, vector<32x128xf32>
    %51 = arith.truncf %50 : vector<32x128xf32> to vector<32x128xbf16>
    %c0_23 = arith.constant 0 : index
    %c0_24 = arith.constant 0 : index
    %52 = vector.load %arg8[%c0_23, %c0_24] : memref<32x64xbf16, #tpu.memory_space<vmem>>, vector<32x64xbf16>
    %c0_25 = arith.constant 0 : index
    %c0_26 = arith.constant 0 : index
    %53 = vector.load %arg9[%c0_25, %c0_26] : memref<32x1xf32, #tpu.memory_space<vmem>>, vector<32x1xf32>
    %c0_27 = arith.constant 0 : index
    %c0_28 = arith.constant 0 : index
    %54 = vector.load %arg10[%c0_27, %c0_28] : memref<32x64xbf16, #tpu.memory_space<vmem>>, vector<32x64xbf16>
    %c0_29 = arith.constant 0 : index
    %c0_30 = arith.constant 0 : index
    %55 = vector.load %arg11[%c0_29, %c0_30] : memref<32x1xf32, #tpu.memory_space<vmem>>, vector<32x1xf32>
    %cst_31 = arith.constant 0.000000e+00 : bf16
    %56 = vector.broadcast %cst_31 : bf16 to vector<32x2xbf16>
    %57 = vector.extract_strided_slice %51 {offsets = [0, 0], sizes = [32, 126], strides = [1, 1]} : vector<32x128xbf16> to vector<32x126xbf16>
    %58 = tpu.concatenate %56, %57 in 1 : vector<32x2xbf16>, vector<32x126xbf16> -> vector<32x128xbf16>
    %59 = tpu.concatenate %58, %51 in 0 : vector<32x128xbf16>, vector<32x128xbf16> -> vector<64x128xbf16>
    %cst_32 = arith.constant dense<0.000000e+00> : vector<32x128xf32>
    %60 = tpu.matmul %52, %59, %cst_32 {dimension_numbers = #tpu.dot_dimension_numbers<[1], [0], [0], [1], [0, 0, 1, 1], [], []>} : vector<32x64xbf16>, vector<64x128xbf16>, vector<32x128xf32> -> vector<32x128xf32>
    %61 = vector.broadcast %53 : vector<32x1xf32> to vector<32x128xf32>
    %62 = arith.addf %60, %61 : vector<32x128xf32>
    %cst_33 = arith.constant 0.000000e+00 : f32
    %63 = vector.broadcast %cst_33 : f32 to vector<32x128xf32>
    %64 = arith.maximumf %62, %63 : vector<32x128xf32>
    %c20_i32 = arith.constant 20 : i32
    %65 = vector.broadcast %c20_i32 : i32 to vector<1x128xi32>
    %66 = arith.cmpi slt, %0, %65 : vector<1x128xi32>
    %cst_34 = arith.constant 0.000000e+00 : f32
    %67 = vector.shape_cast %66 : vector<1x128xi1> to vector<1x128xi1>
    %68 = vector.broadcast %67 : vector<1x128xi1> to vector<32x128xi1>
    %69 = vector.broadcast %cst_34 : f32 to vector<32x128xf32>
    %70 = arith.select %68, %64, %69 : vector<32x128xi1>, vector<32x128xf32>
    %71 = arith.truncf %70 : vector<32x128xf32> to vector<32x128xbf16>
    %cst_35 = arith.constant 0.000000e+00 : bf16
    %72 = vector.broadcast %cst_35 : bf16 to vector<32x2xbf16>
    %73 = vector.extract_strided_slice %71 {offsets = [0, 0], sizes = [32, 126], strides = [1, 1]} : vector<32x128xbf16> to vector<32x126xbf16>
    %74 = tpu.concatenate %72, %73 in 1 : vector<32x2xbf16>, vector<32x126xbf16> -> vector<32x128xbf16>
    %75 = tpu.concatenate %74, %71 in 0 : vector<32x128xbf16>, vector<32x128xbf16> -> vector<64x128xbf16>
    %cst_36 = arith.constant dense<0.000000e+00> : vector<32x128xf32>
    %76 = tpu.matmul %54, %75, %cst_36 {dimension_numbers = #tpu.dot_dimension_numbers<[1], [0], [0], [1], [0, 0, 1, 1], [], []>} : vector<32x64xbf16>, vector<64x128xbf16>, vector<32x128xf32> -> vector<32x128xf32>
    %77 = vector.broadcast %55 : vector<32x1xf32> to vector<32x128xf32>
    %78 = arith.addf %76, %77 : vector<32x128xf32>
    %79 = arith.addf %78, %50 : vector<32x128xf32>
    %cst_37 = arith.constant 0.000000e+00 : f32
    %80 = vector.broadcast %cst_37 : f32 to vector<32x128xf32>
    %81 = arith.maximumf %79, %80 : vector<32x128xf32>
    %c22_i32 = arith.constant 22 : i32
    %82 = vector.broadcast %c22_i32 : i32 to vector<1x128xi32>
    %83 = arith.cmpi slt, %0, %82 : vector<1x128xi32>
    %cst_38 = arith.constant 0.000000e+00 : f32
    %84 = vector.shape_cast %83 : vector<1x128xi1> to vector<1x128xi1>
    %85 = vector.broadcast %84 : vector<1x128xi1> to vector<32x128xi1>
    %86 = vector.broadcast %cst_38 : f32 to vector<32x128xf32>
    %87 = arith.select %85, %81, %86 : vector<32x128xi1>, vector<32x128xf32>
    %c0_39 = arith.constant 0 : index
    %c0_40 = arith.constant 0 : index
    %c0_41 = arith.constant 0 : index
    %88 = vector.load %arg12[%c0_39, %c0_40, %c0_41] : memref<1x32x128xf32, #tpu.memory_space<vmem>>, vector<1x32x128xf32>
    %89 = vector.shape_cast %88 : vector<1x32x128xf32> to vector<32x128xf32>
    %90 = vector.shape_cast %87 : vector<32x128xf32> to vector<1x32x128xf32>
    tpu.vector_store %arg12[%c0_39, %c0_40, %c0_41], %90 {strides = array<i32>} : memref<1x32x128xf32, #tpu.memory_space<vmem>>, vector<1x32x128xf32>,
    return
  }
  func.func @transform_0(%arg0: i32) -> (i32, i32, i32) {
    %c0_i32 = arith.constant 0 : i32
    %c0_i32_0 = arith.constant 0 : i32
    %c0_i32_1 = arith.constant 0 : i32
    return %arg0, %c0_i32, %c0_i32_0 : i32, i32, i32
  }
  func.func @transform_1(%arg0: i32) -> (i32, i32) {
    %c0_i32 = arith.constant 0 : i32
    %c0_i32_0 = arith.constant 0 : i32
    %c0_i32_1 = arith.constant 0 : i32
    return %c0_i32, %c0_i32_0 : i32, i32
  }
  func.func @transform_2(%arg0: i32) -> (i32, i32) {
    %c0_i32 = arith.constant 0 : i32
    %c0_i32_0 = arith.constant 0 : i32
    %c0_i32_1 = arith.constant 0 : i32
    return %c0_i32, %c0_i32_0 : i32, i32
  }
  func.func @transform_3(%arg0: i32) -> (i32, i32) {
    %c0_i32 = arith.constant 0 : i32
    %c0_i32_0 = arith.constant 0 : i32
    %c0_i32_1 = arith.constant 0 : i32
    return %c0_i32, %c0_i32_0 : i32, i32
  }
  func.func @transform_4(%arg0: i32) -> (i32, i32) {
    %c0_i32 = arith.constant 0 : i32
    %c0_i32_0 = arith.constant 0 : i32
    %c0_i32_1 = arith.constant 0 : i32
    return %c0_i32, %c0_i32_0 : i32, i32
  }
  func.func @transform_5(%arg0: i32) -> (i32, i32) {
    %c0_i32 = arith.constant 0 : i32
    %c0_i32_0 = arith.constant 0 : i32
    %c0_i32_1 = arith.constant 0 : i32
    return %c0_i32, %c0_i32_0 : i32, i32
  }
  func.func @transform_6(%arg0: i32) -> (i32, i32) {
    %c0_i32 = arith.constant 0 : i32
    %c0_i32_0 = arith.constant 0 : i32
    %c0_i32_1 = arith.constant 0 : i32
    return %c0_i32, %c0_i32_0 : i32, i32
  }
  func.func @transform_7(%arg0: i32) -> (i32, i32) {
    %c0_i32 = arith.constant 0 : i32
    %c0_i32_0 = arith.constant 0 : i32
    %c0_i32_1 = arith.constant 0 : i32
    return %c0_i32, %c0_i32_0 : i32, i32
  }
  func.func @transform_8(%arg0: i32) -> (i32, i32) {
    %c0_i32 = arith.constant 0 : i32
    %c0_i32_0 = arith.constant 0 : i32
    %c0_i32_1 = arith.constant 0 : i32
    return %c0_i32, %c0_i32_0 : i32, i32
  }
  func.func @transform_9(%arg0: i32) -> (i32, i32) {
    %c0_i32 = arith.constant 0 : i32
    %c0_i32_0 = arith.constant 0 : i32
    %c0_i32_1 = arith.constant 0 : i32
    return %c0_i32, %c0_i32_0 : i32, i32
  }
  func.func @transform_10(%arg0: i32) -> (i32, i32) {
    %c0_i32 = arith.constant 0 : i32
    %c0_i32_0 = arith.constant 0 : i32
    %c0_i32_1 = arith.constant 0 : i32
    return %c0_i32, %c0_i32_0 : i32, i32
  }
  func.func @transform_11(%arg0: i32) -> (i32, i32, i32) {
    %c0_i32 = arith.constant 0 : i32
    %c0_i32_0 = arith.constant 0 : i32
    %c0_i32_1 = arith.constant 0 : i32
    return %arg0, %c0_i32, %c0_i32_0 : i32, i32, i32
  }
}

</mosaic_0001>

<bundles_post_ra>
// kernel: tcn_forward.1
= control target key start
LH: loop header
LB: loop body
LE: loop exit
PB: predicated region body
PF: predicated region fallthrough
CT: control target
= control target key end

     0   :  { %s1292_s17 = smov 0   ;;  %s1514_s0 = inlined_call_operand.vmem [shape: bf16[2,4,128], index: 0, kind: input, shape index: {}]   ;;  %s1515_s1 = inlined_call_operand.vmem [shape: bf16[32,8], index: 1, kind: input, shape index: {}]   ;;  %s1516_s2 = inlined_call_operand.vmem [shape: f32[32,1], index: 2, kind: input, shape index: {}]   ;;  %s1517_s3 = inlined_call_operand.vmem [shape: bf16[32,64], index: 3, kind: input, shape index: {}]   ;;  %s1518_s4 = inlined_call_operand.vmem [shape: f32[32,1], index: 4, kind: input, shape index: {}]   ;;  %s1519_s5 = inlined_call_operand.vmem [shape: bf16[32,4], index: 5, kind: input, shape index: {}]   ;;  %s1520_s6 = inlined_call_operand.vmem [shape: f32[32,1], index: 6, kind: input, shape index: {}]   ;;  %s1521_s7 = inlined_call_operand.vmem [shape: bf16[32,64], index: 7, kind: input, shape index: {}]   ;;  %s1522_s8 = inlined_call_operand.vmem [shape: f32[32,1], index: 8, kind: input, shape index: {}]   ;;  %s1523_s9 = inlined_call_operand.vmem [shape: bf16[32,64], index: 9, kind: input, shape index: {}]   ;;  %s1524_s10 = inlined_call_operand.vmem [shape: f32[32,1], index: 10, kind: input, shape index: {}]   ;;  %s1525_s11 = inlined_call_operand.vmem [shape: f32[2,32,128], index: 11, kind: output, shape index: {}]  }
   0x1 LB: > { %s1048_s18 = sadd.s32 4294967295, %s1226_s17   ;;  %p1052_p0 = scmp.ge.s32.totalorder %s1226_s17, 1  ;;  %s1226_s17 = sphi %s1292_s17, %s21_s17  }
   0x2   : > { %p336_p1 = scmp.lt.s32.totalorder %s1226_s17, 3 }
   0x4   : > { %p337_p2 = pnand %p1052_p0, %p336_p1 }
   0x5   : > { %p375_p3 = scmp.lt.s32.totalorder (!%p337_p2), %s1048_s18, 1  ;;  %v385_v0 = vlaneseq (!%p337_p2)  ;;  %v1228_v1 = vmov (!%p337_p2), 1983009808   ;;  %vm467_vm0 = vcmask (!%p337_p2), 64512   ;;  %v1210_v4 = vld [vmem:[%s1515_s1] sm:$0xff] (!%p337_p2)   ;;  %v393_v6 = vld [vmem:[%s1516_s2 + $0x8] sm:$0xff] (!%p337_p2) }
   0x6   : > { %340 = sbr.rel (%p337_p2) target bundleno = 1434 (0x59a), region = 64  ;;  %v414_v2 = vunpack.c.l.s4 (!%p337_p2), %v1228_v1  ;;  %1135 = vmatprep.mubr.msk.bf16.mxu1 (!%p337_p2), %vm467_vm0, %v1210_v4  ;;  %v1229_v7 = vmov (!%p337_p2), 0   ;;  %v394_v8 = vld [vmem:[%s1516_s2 + $0x10] sm:$0xff] (!%p337_p2)  ;;  %v395_v12 = vld [vmem:[%s1516_s2 + $0x18] sm:$0xff] (!%p337_p2)  ;;  %s1230_s12 = smov (!%p337_p2), 1   ;;  %v392_v13 = vld [vmem:[%s1516_s2] sm:$0xff] (!%p337_p2) }
   0x7   : > { %v417_v3 = vshrl.u32 (!%p337_p2), %v385_v0, 7  ;;  %1208 = vset.pattern.permute.xlu1 (!%p337_p2), %v1229_v7  ;;  %1207 = vset.pattern.permute.xlu0 (!%p337_p2), %v1229_v7  ;;  %vm422_vm1 = vcmask (!%p337_p2), 7168   ;;  %vm434_vm2 = vcmask (!%p337_p2), 1041408   ;;  %vm474_vm3 = vcmask (!%p337_p2), 1043456   ;;  %v1211_v20 = vld [vmem:[%s1515_s1 + $0x8] sm:$0xff] (!%p337_p2)   ;;  %v1212_v47 = vld [vmem:[%s1517_s3] sm:$0xff] (!%p337_p2)  }
   0x8   : > { %v415_v5 = vunpack.c.0.s8 (!%p337_p2), %v414_v2  ;;  %444 = vperm.xlu1 (!%p337_p2), %1208, %v393_v6   ;;  %v1334_v24 = vand.u32 (!%p337_p2), 127, %v385_v0  ;;  %v409_v46 = vld [vmem:[%s1520_s6 + $0x8] sm:$0xff] (!%p337_p2)  ;;  %vm581_vm5 = vcmask (!%p337_p2), 523264   ;;  %v408_v48 = vld [vmem:[%s1520_s6] sm:$0xff] (!%p337_p2)  ;;  %v411_v51 = vld [vmem:[%s1520_s6 + $0x18] sm:$0xff] (!%p337_p2)  ;;  %vm674_vm8 = vcmask (!%p337_p2), 31744  }
   0x9   : > { %v401_v49 = vld [vmem:[%s1518_s4 + $0x8] sm:$0xff] (!%p337_p2)  ;;  %v400_v50 = vld [vmem:[%s1518_s4] sm:$0xff] (!%p337_p2)  ;;  %v410_v52 = vld [vmem:[%s1520_s6 + $0x10] sm:$0xff] (!%p337_p2)  ;;  %s1231_s26 = smov (!%p337_p2), 2   ;;  %vm772_vm11 = vcmask (!%p337_p2), 15360  }
   0xa   : > { %v418_v9 = vsub.s32 (!%p337_p2), %v415_v5, %v417_v3  ;;  %vm530_vm4 = vcmp.lt.s32.totalorder (!%p337_p2), %v1334_v24, 17  ;;  %v403_v53 = vld [vmem:[%s1518_s4 + $0x18] sm:$0xff] (!%p337_p2)  ;;  %v402_v54 = vld [vmem:[%s1518_s4 + $0x10] sm:$0xff] (!%p337_p2)  ;;  %vm1062_vm6 = vmneg (!%p337_p2), %vm422_vm1  ;;  %vm637_vm9 = vcmp.lt.s32.totalorder (!%p337_p2), %v1334_v24, 16  ;;  %vm741_vm10 = vcmp.lt.s32.totalorder (!%p337_p2), %v1334_v24, 18 }
   0xb   : > { %vm1066_vm7 = vmpackc.low (!%p337_p2), %vm530_vm4, %vm530_vm4  ;;  %v1213_v57 = vld [vmem:[%s1517_s3 + $0x8] sm:$0xff] (!%p337_p2)   ;;  %v1214_v58 = vld [vmem:[%s1519_s5] sm:$0xff] (!%p337_p2)   ;;  %vm868_vm14 = vcmp.lt.s32.totalorder (!%p337_p2), %v1334_v24, 20 }
   0xc   : > { %449 = vperm.xlu1 (!%p337_p2), %1208, %v394_v8   ;;  %v1215_v60 = vld [vmem:[%s1519_s5 + $0x8] sm:$0xff] (!%p337_p2)   ;;  %vm1433_vm12 = vmneg (!%p337_p2), %vm772_vm11 }
   0xd   : > { %s1529_s18 = smov (!%p375_p3, %s1048_s18), 1  ;;  %vm1084_vm13 = vmpackc.low %vm741_vm10, %vm741_vm10 }
   0xe   : > { %s1053_s23 = sshll.u32 %s1529_s18, 1  ;;  %vm1098_vm15 = vmpackc.low %vm868_vm14, %vm868_vm14  ;;  %s1108_s15 = sshll.u32 %s1529_s18, 5 }
   0xf   : > { %s378_s28 = scalar_lea.vmem %s1514_s0, %s1053_s23  ;;  %s383_s20 = scalar_lea.vmem %s1525_s11, %s1108_s15 }
  0x10   : > { %v1316_v10 = vld [vmem:[%s378_s28] sm:$0x3]  ;;  %454 = vperm.xlu1 %1208, %v395_v12  }
  0x11   : > { %v419_v11 = vrot.slane %v1316_v10, %v418_v9  ;;  %v426_v14 = vcombine.low %v1316_v10, %v1316_v10  ;;  %v682_v59 = vsel %vm434_vm2, %v1316_v10, 0 }
  0x13   : > { %420 = vrot.lane.b32.xlu0 %v419_v11, %s1230_s12  ;;  %v433_v15 = vrot.slane %v426_v14, %v418_v9 }
  0x17   : > { %439 = vperm.xlu0 %1207, %v392_v13  }
  0x85   : > { %v421_v16 = vpop.permute.xlu0 %420 }
  0x86   : > { %v425_v17 = vsel %vm422_vm1, 0, %v421_v16 }
  0x87   : > { %v436_v18 = vsel %vm434_vm2, %v425_v17, %v433_v15  ;;  %v445_v21 = vpop.permute.xlu1 %444 }
  0x88   : > { %1193 = vmatprep.subr.msk.bf16.mxu1 %vm474_vm3, %v436_v18  ;;  %v475_v19 = vsel %vm474_vm3, %v436_v18, 0 }
  0x89   : > { %1134 = vmatpush3.bf16.msra.mxu1 %v475_v19 }
  0x8b   : > { %v450_v22 = vpop.permute.xlu1 %449 }
  0x8c   : > { %1136 = vmatmul.mubr.msk.bf16.vlgmr.msra.gmra.mrb[0].mxu1 %vm467_vm0, %v1211_v20  ;;  %vm982_vm0 = vcmp.lt.s32.totalorder %v1334_v24, 22 }
  0x8d   : > { %1147 = vmatprep.mubr.msk.bf16.mxu1 %vm581_vm5, %v1212_v47 }
  0x8f   : > { %v455_v28 = vpop.permute.xlu1 %454 }
  0x96   : > { %v440_v23 = vpop.permute.xlu0 %439 }
 0x15f   : > { %v1137_v25 = vpop.f32.mrb[0].mxu1 }
 0x160   : > { %v520_v26 = vadd.f32 %v1137_v25, %v450_v22  ;;  %v511_v27 = vpop.f32.mrb[1].mxu1 }
 0x161   : > { %v512_v29 = vadd.f32 %v511_v27, %v440_v23  ;;  %v1138_v30 = vpop.f32.mrb[2].mxu1 }
 0x162   : > { %v528_v31 = vmax.f32 %v520_v26, 0.0  ;;  %v523_v32 = vadd.f32 %v1138_v30, %v455_v28  ;;  %v514_v33 = vpop.f32.mrb[3].mxu1 }
 0x163   : > { %v526_v34 = vmax.f32 %v512_v29, 0.0  ;;  %v515_v35 = vadd.f32 %v514_v33, %v445_v21 }
 0x164   : > { %v529_v36 = vmax.f32 %v523_v32, 0.0  ;;  %v535_v38 = vsel %vm530_vm4, %v528_v31, 0.0 }
 0x165   : > { %v527_v37 = vmax.f32 %v515_v35, 0.0  ;;  %v533_v41 = vsel %vm530_vm4, %v526_v34, 0.0  ;;  %v1216_v35 = vld [vmem:[%s1521_s7] sm:$0xff]  }
 0x166   : > { %v536_v39 = vsel %vm530_vm4, %v529_v36, 0.0  ;;  %v1070_v40 = vpack.c.bf16 %v529_v36, %v528_v31  ;;  %v754_v36 = vld [vmem:[%s1522_s8] sm:$0xff]  ;;  %1165 = vmatprep.mubr.msk.bf16.mxu0 %vm581_vm5, %v1216_v35 }
 0x167   : > { %v534_v42 = vsel %vm530_vm4, %v527_v37, 0.0  ;;  %v1067_v43 = vpack.c.bf16 %v527_v37, %v526_v34  ;;  %v538_v44 = vpack.c.bf16 %v536_v39, %v535_v38  ;;  %v755_v34 = vld [vmem:[%s1522_s8 + $0x8] sm:$0xff]  ;;  %v757_v37 = vld [vmem:[%s1522_s8 + $0x18] sm:$0xff]  ;;  %v756_v38 = vld [vmem:[%s1522_s8 + $0x10] sm:$0xff] }
 0x168   : > { %v537_v45 = vpack.c.bf16 %v534_v42, %v533_v41  ;;  %v1217_v42 = vld [vmem:[%s1521_s7 + $0x8] sm:$0xff]  }
 0x169   : > { %543 = vrot.lane.b32.xlu1 %v538_v44, %s1230_s12 }
 0x16a   : > { %541 = vrot.lane.b32.xlu0 %v537_v45, %s1230_s12 }
 0x16d   : > { %647 = vperm.xlu1 %1208, %v409_v46  }
 0x16e   : > { %642 = vperm.xlu0 %1207, %v408_v48  }
 0x171   : > { %558 = vperm.xlu1 %1208, %v401_v49  }
 0x172   : > { %553 = vperm.xlu0 %1207, %v400_v50  }
 0x175   : > { %657 = vperm.xlu1 %1208, %v411_v51  }
 0x176   : > { %652 = vperm.xlu0 %1207, %v410_v52  }
 0x179   : > { %568 = vperm.xlu1 %1208, %v403_v53  }
 0x17a   : > { %563 = vperm.xlu0 %1207, %v402_v54  }
 0x1db   : > { %v544_v56 = vpop.permute.xlu1 %543 }
 0x1dc   : > { %v542_v55 = vpop.permute.xlu0 %541 }
 0x1dd   : > { %1139 = vmatprep.subr.msk.bf16.mxu1 %vm1062_vm6, %v542_v55 }
 0x1de   : > { %1140 = vmatpush3.bf16.msk.msra.mxu1 %vm1062_vm6, %v542_v55 }
 0x1df   : > { %1141 = vmatprep.subr.msk.bf16.mxu1 %vm1062_vm6, %v544_v56 }
 0x1e2   : > { %1142 = vmatpush3.bf16.msk.msra.mxu1 %vm1062_vm6, %v544_v56 }
 0x1e3   : > { %1143 = vmatprep.subr.msk.bf16.mxu1 %vm1066_vm7, %v1067_v43 }
 0x1e6   : > { %1144 = vmatpush3.bf16.msk.msra.mxu1 %vm1066_vm7, %v1067_v43 }
 0x1e7   : > { %1145 = vmatprep.subr.msk.bf16.mxu1 %vm1066_vm7, %v1070_v40 }
 0x1ea   : > { %1146 = vmatpush3.bf16.msk.msra.mxu1 %vm1066_vm7, %v1070_v40 }
 0x1eb   : > { %1194 = vmatprep.subr.msk.bf16.mxu1 %vm434_vm2, %v1316_v10 }
 0x1ec   : > { %v648_v62 = vpop.permute.xlu1 %647 }
 0x1ed   : > { %1148 = vmatmul.mubr.msk.bf16.vlgmr.msra.gmra.mrb[4].mxu1 %vm581_vm5, %v1213_v57  ;;  %v643_v61 = vpop.permute.xlu0 %642  ;;  %v661_v11 = vsel %vm637_vm9, %v648_v62, 0.0 }
 0x1ee   : > { %1152 = vmatpush3.bf16.msra.mxu1 %v682_v59  ;;  %1153 = vmatprep.mubr.msk.bf16.mxu1 %vm674_vm8, %v1214_v58  ;;  %v660_v6 = vsel %vm637_vm9, %v643_v61, 0.0 }
 0x1f0   : > { %v559_v0 = vpop.permute.xlu1 %558 }
 0x1f1   : > { %v554_v63 = vpop.permute.xlu0 %553  ;;  %v1187_v15 = vadd.f32 %v661_v11, %v559_v0 }
 0x1f2   : > { %v1183_v8 = vadd.f32 %v660_v6, %v554_v63  ;;  %v765_v6 = vld [vmem:[%s1524_s10 + $0x18] sm:$0xff] }
 0x1f4   : > { %v658_v2 = vpop.permute.xlu1 %657 }
 0x1f5   : > { %v653_v1 = vpop.permute.xlu0 %652  ;;  %v663_v9 = vsel %vm637_vm9, %v658_v2, 0.0 }
 0x1f6   : > { %v662_v4 = vsel %vm637_vm9, %v653_v1, 0.0 }
 0x1f8   : > { %v569_v5 = vpop.permute.xlu1 %568 }
 0x1f9   : > { %1154 = vmatmul.mubr.msk.bf16.vlgmr.msra.gmra.mrb[4].mxu1 %vm674_vm8, %v1215_v60  ;;  %v564_v3 = vpop.permute.xlu0 %563  ;;  %v1185_v12 = vadd.f32 %v663_v9, %v569_v5  ;;  %v762_v5 = vld [vmem:[%s1524_s10] sm:$0xff] }
 0x1fa   : > { %v1181_v7 = vadd.f32 %v662_v4, %v564_v3  ;;  %v763_v3 = vld [vmem:[%s1524_s10 + $0x8] sm:$0xff]  ;;  %v1218_v4 = vld [vmem:[%s1523_s9] sm:$0xff]  }
 0x2cc   : > { %v1155_v10 = vpop.f32.mrb[4].mxu1 }
 0x2cd   : > { %v1182_v13 = vadd.f32 %v1181_v7, %v1155_v10  ;;  %v718_v14 = vpop.f32.mrb[5].mxu1  ;;  %v764_v7 = vld [vmem:[%s1524_s10 + $0x10] sm:$0xff]  ;;  %v1219_v10 = vld [vmem:[%s1523_s9 + $0x8] sm:$0xff]  }
 0x2ce   : > { %v1184_v16 = vadd.f32 %v1183_v8, %v718_v14  ;;  %v1156_v17 = vpop.f32.mrb[6].mxu1 }
 0x2cf   : > { %v739_v18 = vmax.f32 %v1182_v13, 0.0  ;;  %v1186_v19 = vadd.f32 %v1185_v12, %v1156_v17  ;;  %v721_v20 = vpop.f32.mrb[7].mxu1 }
 0x2d0   : > { %v737_v21 = vmax.f32 %v1184_v16, 0.0  ;;  %v1188_v22 = vadd.f32 %v1187_v15, %v721_v20 }
 0x2d1   : > { %v740_v23 = vmax.f32 %v1186_v19, 0.0  ;;  %v1397_v26 = vsel %vm741_vm10, %v739_v18, 0.0 }
 0x2d2   : > { %v738_v25 = vmax.f32 %v1188_v22, 0.0  ;;  %v1405_v29 = vsel %vm741_vm10, %v737_v21, 0.0 }
 0x2d3   : > { %v1401_v27 = vsel %vm741_vm10, %v740_v23, 0.0  ;;  %v1088_v28 = vpack.c.bf16 %v740_v23, %v739_v18 }
 0x2d4   : > { %v1409_v30 = vsel %vm741_vm10, %v738_v25, 0.0  ;;  %v1085_v31 = vpack.c.bf16 %v738_v25, %v737_v21  ;;  %v749_v32 = vpack.c.bf16 %v1401_v27, %v1397_v26 }
 0x2d5   : > { %v748_v33 = vpack.c.bf16 %v1409_v30, %v1405_v29 }
 0x2d6   : > { %770 = vrot.lane.b32.xlu1 %v749_v32, %s1231_s26 }
 0x2d7   : > { %768 = vrot.lane.b32.xlu0 %v748_v33, %s1231_s26 }
 0x2da   : > { %786 = vperm.xlu1 %1208, %v755_v34  }
 0x2db   : > { %781 = vperm.xlu0 %1207, %v754_v36  }
 0x2de   : > { %796 = vperm.xlu1 %1208, %v757_v37  }
 0x2df   : > { %791 = vperm.xlu0 %1207, %v756_v38  }
 0x348   : > { %v771_v41 = vpop.permute.xlu1 %770 }
 0x349   : > { %v769_v40 = vpop.permute.xlu0 %768 }
 0x34a   : > { %1157 = vmatprep.subr.msk.bf16.mxu0 %vm1433_vm12, %v769_v40 }
 0x34b   : > { %1158 = vmatpush3.bf16.msk.msra.mxu0 %vm1433_vm12, %v769_v40 }
 0x34c   : > { %1159 = vmatprep.subr.msk.bf16.mxu0 %vm1433_vm12, %v771_v41 }
 0x34f   : > { %1160 = vmatpush3.bf16.msk.msra.mxu0 %vm1433_vm12, %v771_v41 }
 0x350   : > { %1161 = vmatprep.subr.msk.bf16.mxu0 %vm1084_vm13, %v1085_v31 }
 0x353   : > { %1162 = vmatpush3.bf16.msk.msra.mxu0 %vm1084_vm13, %v1085_v31 }
 0x354   : > { %1163 = vmatprep.subr.msk.bf16.mxu0 %vm1084_vm13, %v1088_v28 }
 0x357   : > { %1164 = vmatpush3.bf16.msk.msra.mxu0 %vm1084_vm13, %v1088_v28 }
 0x359   : > { %v787_v44 = vpop.permute.xlu1 %786 }
 0x35a   : > { %1166 = vmatmul.mubr.msk.bf16.vlgmr.msra.gmra.mrb[0].mxu0 %vm581_vm5, %v1217_v42  ;;  %v782_v43 = vpop.permute.xlu0 %781 }
 0x35b   : > { %1177 = vmatprep.mubr.msk.bf16.mxu0 %vm581_vm5, %v1218_v4 }
 0x35d   : > { %v797_v49 = vpop.permute.xlu1 %796 }
 0x35e   : > { %v792_v45 = vpop.permute.xlu0 %791 }
 0x42d   : > { %v1167_v46 = vpop.f32.mrb[0].mxu0 }
 0x42e   : > { %v858_v47 = vadd.f32 %v1167_v46, %v792_v45  ;;  %v849_v48 = vpop.f32.mrb[1].mxu0 }
 0x42f   : > { %v850_v50 = vadd.f32 %v849_v48, %v782_v43  ;;  %v1168_v51 = vpop.f32.mrb[2].mxu0 }
 0x430   : > { %v866_v52 = vmax.f32 %v858_v47, 0.0  ;;  %v861_v53 = vadd.f32 %v1168_v51, %v797_v49  ;;  %v852_v54 = vpop.f32.mrb[3].mxu0 }
 0x431   : > { %v864_v55 = vmax.f32 %v850_v50, 0.0  ;;  %v853_v56 = vadd.f32 %v852_v54, %v787_v44 }
 0x432   : > { %v867_v57 = vmax.f32 %v861_v53, 0.0  ;;  %v873_v59 = vsel %vm868_vm14, %v866_v52, 0.0 }
 0x433   : > { %v865_v58 = vmax.f32 %v853_v56, 0.0  ;;  %v871_v62 = vsel %vm868_vm14, %v864_v55, 0.0 }
 0x434   : > { %v874_v60 = vsel %vm868_vm14, %v867_v57, 0.0  ;;  %v1102_v61 = vpack.c.bf16 %v867_v57, %v866_v52 }
 0x435   : > { %v872_v63 = vsel %vm868_vm14, %v865_v58, 0.0  ;;  %v1099_v0 = vpack.c.bf16 %v865_v58, %v864_v55  ;;  %v876_v1 = vpack.c.bf16 %v874_v60, %v873_v59 }
 0x436   : > { %v875_v2 = vpack.c.bf16 %v872_v63, %v871_v62 }
 0x437   : > { %881 = vrot.lane.b32.xlu1 %v876_v1, %s1231_s26 }
 0x438   : > { %879 = vrot.lane.b32.xlu0 %v875_v2, %s1231_s26 }
 0x43b   : > { %896 = vperm.xlu1 %1208, %v763_v3  }
 0x43c   : > { %891 = vperm.xlu0 %1207, %v762_v5  }
 0x43f   : > { %906 = vperm.xlu1 %1208, %v765_v6  }
 0x440   : > { %901 = vperm.xlu0 %1207, %v764_v7  }
 0x4a9   : > { %v882_v9 = vpop.permute.xlu1 %881 }
 0x4aa   : > { %v880_v8 = vpop.permute.xlu0 %879 }
 0x4ab   : > { %1169 = vmatprep.subr.msk.bf16.mxu0 %vm1433_vm12, %v880_v8 }
 0x4ac   : > { %1170 = vmatpush3.bf16.msk.msra.mxu0 %vm1433_vm12, %v880_v8 }
 0x4ad   : > { %1171 = vmatprep.subr.msk.bf16.mxu0 %vm1433_vm12, %v882_v9 }
 0x4b0   : > { %1172 = vmatpush3.bf16.msk.msra.mxu0 %vm1433_vm12, %v882_v9 }
 0x4b1   : > { %1173 = vmatprep.subr.msk.bf16.mxu0 %vm1098_vm15, %v1099_v0 }
 0x4b4   : > { %1174 = vmatpush3.bf16.msk.msra.mxu0 %vm1098_vm15, %v1099_v0 }
 0x4b5   : > { %1175 = vmatprep.subr.msk.bf16.mxu0 %vm1098_vm15, %v1102_v61 }
 0x4b8   : > { %1176 = vmatpush3.bf16.msk.msra.mxu0 %vm1098_vm15, %v1102_v61 }
 0x4ba   : > { %v897_v12 = vpop.permute.xlu1 %896 }
 0x4bb   : > { %1178 = vmatmul.mubr.msk.bf16.vlgmr.msra.gmra.mrb[4].mxu0 %vm581_vm5, %v1219_v10  ;;  %v892_v11 = vpop.permute.xlu0 %891 }
 0x4be   : > { %v907_v17 = vpop.permute.xlu1 %906 }
 0x4bf   : > { %v902_v13 = vpop.permute.xlu0 %901 }
 0x58e   : > { %v1179_v14 = vpop.f32.mrb[4].mxu0 }
 0x58f   : > { %v968_v15 = vadd.f32 %v1179_v14, %v902_v13  ;;  %v959_v16 = vpop.f32.mrb[5].mxu0 }
 0x590   : > { %v960_v18 = vadd.f32 %v959_v16, %v892_v11  ;;  %v1180_v19 = vpop.f32.mrb[6].mxu0 }
 0x591   : > { %v976_v20 = vadd.f32 %v968_v15, %v1397_v26  ;;  %v971_v21 = vadd.f32 %v1180_v19, %v907_v17  ;;  %v962_v22 = vpop.f32.mrb[7].mxu0 }
 0x592   : > { %v974_v23 = vadd.f32 %v960_v18, %v1405_v29  ;;  %v963_v25 = vadd.f32 %v962_v22, %v897_v12 }
 0x593   : > { %v980_v28 = vmax.f32 %v976_v20, 0.0  ;;  %v977_v31 = vadd.f32 %v971_v21, %v1401_v27 }
 0x594   : > { %v978_v32 = vmax.f32 %v974_v23, 0.0  ;;  %v975_v33 = vadd.f32 %v963_v25, %v1409_v30 }
 0x595   : > { %v987_v26 = vsel %vm982_vm0, %v980_v28, 0.0  ;;  %v981_v34 = vmax.f32 %v977_v31, 0.0 }
 0x596   : > { %991 = vst [vmem:[%s383_s20 + $0x10] sm:$0xff] %v987_v26  ;;  %v985_v35 = vsel %vm982_vm0, %v978_v32, 0.0  ;;  %v979_v29 = vmax.f32 %v975_v33, 0.0 }
 0x597   : > { %989 = vst [vmem:[%s383_s20] sm:$0xff] %v985_v35  ;;  %v988_v36 = vsel %vm982_vm0, %v981_v34, 0.0 }
 0x598   : > { %992 = vst [vmem:[%s383_s20 + $0x18] sm:$0xff] %v988_v36  ;;  %v986_v27 = vsel %vm982_vm0, %v979_v29, 0.0 }
 0x599   : > { %990 = vst [vmem:[%s383_s20 + $0x8] sm:$0xff] %v986_v27 }
 0x59a PF: > { %s21_s17 = sadd.s32 1, %s1226_s17  }
 0x59b   : > { %p18_p4 = scmp.ge.s32.totalorder %s21_s17, 4  }
 0x59d   :  { %20 = sbr.rel (!%p18_p4) target bundleno = 1 (0x1), region = 94 }

</bundles_post_ra>
